<compile_context>
chip_gen: v6e
topology: v6e:2x2x1
jax: 0.10.0
libtpu: 0.0.40
codegen_flags: <defaults>
</compile_context>

<pallas_src>
import functools

import jax
import jax.numpy as jnp
import numpy as np
from jax import lax
from jax.experimental import pallas as pl
from jax.experimental.pallas import tpu as pltpu


_EPS = 1e-8
# Per-VMEM-buffer budget (f32 elements) used to size the lane tile; keeps the
# double-buffered in+out footprint (plus f32 temporaries) well under every
# generation's default scoped VMEM (16 MiB v5e, 32 MiB v6e/v7x, 64 MiB phys v7x).
_BUF_ELEMS = 256 * 1024            # ~1 MiB of f32 per buffer
_MAX_LANE_TILE = 4096              # multiple of 128
_MAX_ROW_TILE = 1024               # multiple of 8


def _pixel_norm_mid_kernel(x_ref, o_ref, *, inv_c):
    # x_ref: (1, C, tile) block; normalize over axis 1 (channels, on sublanes).
    x = x_ref[...].astype(jnp.float32)
    mean_sq = jnp.sum(x * x, axis=1, keepdims=True) * inv_c
    inv = lax.rsqrt(mean_sq + _EPS)           # EUP slot; one per spatial column
    o_ref[...] = (x * inv).astype(o_ref.dtype)


def _pixel_norm_last_kernel(x_ref, o_ref, *, inv_c):
    # x_ref: (tile_rows, C) block; normalize over the last (lane) axis.
    x = x_ref[...].astype(jnp.float32)
    mean_sq = jnp.sum(x * x, axis=-1, keepdims=True) * inv_c
    inv = lax.rsqrt(mean_sq + _EPS)
    o_ref[...] = (x * inv).astype(o_ref.dtype)


def _cost(x, c):
    total = int(np.prod(x.shape))
    return pl.CostEstimate(
        flops=3 * total,
        transcendentals=max(total // max(c, 1), 1),
        bytes_accessed=2 * total * x.dtype.itemsize,
    )


@functools.partial(jax.jit, static_argnames=("feature_dim",))
def pixel_norm(x: jax.Array, feature_dim: int) -> jax.Array:
    """PixelNorm over `feature_dim`; hot path is a Pallas TPU kernel."""
    shape = x.shape
    ndim = x.ndim
    fd = feature_dim % ndim
    C = shape[fd]

    if fd == ndim - 1:
        # Reduction axis is already on lanes: flatten to (rows, C), no transpose.
        rows = int(np.prod(shape[:-1])) if ndim > 1 else 1
        x2d = x.reshape(rows, C)
        # Row tile: full rows if small, otherwise a large multiple of 8;
        # pl.cdiv + partial last block (no silent giant fallback).
        tile = rows if rows <= _MAX_ROW_TILE else _MAX_ROW_TILE
        grid = (pl.cdiv(rows, tile),)
        out2d = pl.pallas_call(
            functools.partial(_pixel_norm_last_kernel, inv_c=1.0 / C),
            out_shape=jax.ShapeDtypeStruct((rows, C), x.dtype),
            grid=grid,
            in_specs=[pl.BlockSpec((tile, C), lambda i: (i, 0))],
            out_specs=pl.BlockSpec((tile, C), lambda i: (i, 0)),
            compiler_params=pltpu.CompilerParams(
                dimension_semantics=("parallel",)),
            cost_estimate=_cost(x, C),
        )(x2d)
        return out2d.reshape(shape)

    # General case (e.g. NCHW with feature_dim=1): free reshape to
    # (pre, C, post). Spatial axis stays last -> lane-dense loads/stores,
    # and NO HBM transpose round-trip.
    pre = int(np.prod(shape[:fd])) if fd > 0 else 1
    post = int(np.prod(shape[fd + 1:]))
    x3d = x.reshape(pre, C, post)

    if post <= _MAX_LANE_TILE:
        tile = post                          # block equals full trailing dim
    else:
        tile = (_BUF_ELEMS // max(C, 1)) // 128 * 128
        tile = max(128, min(_MAX_LANE_TILE, tile))
    grid = (pre, pl.cdiv(post, tile))

    out3d = pl.pallas_call(
        functools.partial(_pixel_norm_mid_kernel, inv_c=1.0 / C),
        out_shape=jax.ShapeDtypeStruct((pre, C, post), x.dtype),
        grid=grid,
        in_specs=[pl.BlockSpec((1, C, tile), lambda i, j: (i, 0, j))],
        out_specs=pl.BlockSpec((1, C, tile), lambda i, j: (i, 0, j)),
        compiler_params=pltpu.CompilerParams(
            dimension_semantics=("parallel", "parallel")),
        cost_estimate=_cost(x, C),
    )(x3d)
    return out3d.reshape(shape)


def _pixel_norm_ref(x: jax.Array, feature_dim: int) -> jax.Array:
    xf = x.astype(jnp.float32)
    ms = jnp.mean(xf * xf, axis=feature_dim, keepdims=True)
    return (xf / jnp.sqrt(ms + 1e-8)).astype(x.dtype)


if __name__ == "__main__":
    # PixelNorm has no learnable parameters (only the static feature_dim).
    key = jax.random.PRNGKey(0)

    # NCHW input, feature_dim=1 (channel pixel-norm, StyleGAN convention).
    x = jax.random.normal(key, (2, 4, 16, 16), dtype=jnp.float32)
    out = jax.block_until_ready(pixel_norm(x, 1))
    ref = _pixel_norm_ref(x, 1)
    np.testing.assert_allclose(np.asarray(out), np.asarray(ref),
                               rtol=1e-5, atol=1e-5)

    # Also exercise the feature_dim == last-axis path.
    x2 = jax.random.normal(jax.random.PRNGKey(1), (2, 8, 32), dtype=jnp.float32)
    out2 = jax.block_until_ready(pixel_norm(x2, -1))
    ref2 = _pixel_norm_ref(x2, -1)
    np.testing.assert_allclose(np.asarray(out2), np.asarray(ref2),
                               rtol=1e-5, atol=1e-5)

    print("KERNEL_OK")
</pallas_src>

<mosaic_0001>
module attributes {stable_mosaic.version = 11 : i64} {
  func.func @_pixel_norm_mid_kernel(%arg0: i32, %arg1: i32, %arg2: memref<1x4x256xf32, #tpu.memory_space<vmem>>, %arg3: memref<1x4x256xf32, #tpu.memory_space<vmem>>) attributes {dimension_semantics = [#tpu.dimension_semantics<parallel>, #tpu.dimension_semantics<parallel>], iteration_bounds = array<i64: 2, 1>, scalar_prefetch = 0 : i64, scratch_operands = 0 : i64, tpu.core_type = #tpu.core_type<tc>, window_params = [{transform_indices = @transform_0, window_bounds = array<i64: 1, 4, 256>}, {transform_indices = @transform_1, window_bounds = array<i64: 1, 4, 256>}]} {
    %c0 = arith.constant 0 : index
    %c0_0 = arith.constant 0 : index
    %c0_1 = arith.constant 0 : index
    %0 = vector.load %arg2[%c0, %c0_0, %c0_1] : memref<1x4x256xf32, #tpu.memory_space<vmem>>, vector<1x4x256xf32>
    %1 = arith.mulf %0, %0 : vector<1x4x256xf32>
    %cst = arith.constant dense<0.000000e+00> : vector<1x256xf32>
    %2 = vector.multi_reduction <add>, %1, %cst [1] : vector<1x4x256xf32> to vector<1x256xf32>
    %3 = vector.shape_cast %2 : vector<1x256xf32> to vector<1x1x256xf32>
    %cst_2 = arith.constant 2.500000e-01 : f32
    %4 = vector.broadcast %cst_2 : f32 to vector<1x1x256xf32>
    %5 = arith.mulf %3, %4 : vector<1x1x256xf32>
    %cst_3 = arith.constant 9.99999993E-9 : f32
    %6 = vector.broadcast %cst_3 : f32 to vector<1x1x256xf32>
    %7 = arith.addf %5, %6 : vector<1x1x256xf32>
    %8 = math.rsqrt %7 : vector<1x1x256xf32>
    %9 = vector.broadcast %8 : vector<1x1x256xf32> to vector<1x4x256xf32>
    %10 = arith.mulf %0, %9 : vector<1x4x256xf32>
    %c0_4 = arith.constant 0 : index
    %c0_5 = arith.constant 0 : index
    %c0_6 = arith.constant 0 : index
    %11 = vector.load %arg3[%c0_4, %c0_5, %c0_6] : memref<1x4x256xf32, #tpu.memory_space<vmem>>, vector<1x4x256xf32>
    tpu.vector_store %arg3[%c0_4, %c0_5, %c0_6], %10 {strides = array<i32>} : memref<1x4x256xf32, #tpu.memory_space<vmem>>, vector<1x4x256xf32>,
    return
  }
  func.func @transform_0(%arg0: i32, %arg1: i32) -> (i32, i32, i32) {
    %c0_i32 = arith.constant 0 : i32
    %c0_i32_0 = arith.constant 0 : i32
    return %arg0, %c0_i32, %arg1 : i32, i32, i32
  }
  func.func @transform_1(%arg0: i32, %arg1: i32) -> (i32, i32, i32) {
    %c0_i32 = arith.constant 0 : i32
    %c0_i32_0 = arith.constant 0 : i32
    return %arg0, %c0_i32, %arg1 : i32, i32, i32
  }
}

</mosaic_0001>

<bundles_post_ra>
// kernel: pixel_norm.1
= control target key start
LH: loop header
LB: loop body
LE: loop exit
PB: predicated region body
PF: predicated region fallthrough
CT: control target
= control target key end

     0   :  { %s350_s6 = smov 0   ;;  %s352_s7 = smov 0   ;;  %s390_s0 = inlined_call_operand.vmem [shape: f32[2,4,256], index: 0, kind: input, shape index: {}]   ;;  %s391_s1 = inlined_call_operand.vmem [shape: f32[2,4,256], index: 1, kind: output, shape index: {}]  }
   0x1   :  { %s354_s8 = smov 0  }
   0x2 LB: > { %s23_s9 = sadd.s32 1, %s334_s7  ;;  %p279_p0 = scmp.ge.s32.totalorder %s338_s8, 1  ;;  %s338_s8 = sphi %s354_s8, %s11_s8   ;;  %s334_s7 = sphi %s352_s7, %s393_s7   ;;  %s330_s6 = sphi %s350_s6, %s392_s6  }
   0x3   : > { %p25_p1 = scmp.ge.s32.totalorder %s23_s9, 2  ;;  %p108_p2 = scmp.lt.s32.totalorder %s338_s8, 3 }
   0x5   : > { %s395_s9 = smov (%p25_p1, %s23_s9), 0  ;;  %p109_p3 = pnand %p279_p0, %p108_p2 }
   0x6   : > { %p137_p4 = scmp.lt.s32.totalorder (!%p109_p3), %s330_s6, 1 }
   0x7   : > { %112 = sbr.rel (%p109_p3) target bundleno = 56 (0x38), region = 24 }
   0xc   : > { %s397_s6 = smov (!%p137_p4, %s330_s6), 1  ;;  %vm161_vm0 = vcmask 1043456  }
   0xd   : > { %s286_s10 = sshll.u32 %s397_s6, 3 }
   0xe   : > { %s144_s13 = scalar_lea.vmem %s390_s0, %s286_s10  ;;  %s154_s16 = scalar_lea.vmem %s391_s1, %s286_s10 }
   0xf   : > { %v156_v0 = vld [vmem:[%s144_s13] sm:$0xff] }
  0x10   : > { %v157_v1 = vmul.f32 %v156_v0, %v156_v0 }
  0x12   : > { %v159_v2 = vcombine.high %v157_v1, %v157_v1  ;;  %v162_v3 = vsel %vm161_vm0, %v157_v1, 0.0 }
  0x13   : > { %v163_v4 = vrot.slane %v162_v3, 4 }
  0x14   : > { %v169_v5 = vsel %vm161_vm0, %v159_v2, 0.0 }
  0x15   : > { %v164_v6 = vadd.f32 %v163_v4, %v162_v3  ;;  %v170_v7 = vrot.slane %v169_v5, 4 }
  0x17   : > { %v165_v8 = vrot.slane %v164_v6, 2  ;;  %v171_v9 = vadd.f32 %v170_v7, %v169_v5 }
  0x19   : > { %v166_v10 = vadd.f32 %v165_v8, %v164_v6  ;;  %v172_v11 = vrot.slane %v171_v9, 2 }
  0x1b   : > { %v167_v12 = vrot.slane %v166_v10, 1  ;;  %v173_v13 = vadd.f32 %v172_v11, %v171_v9 }
  0x1d   : > { %v168_v14 = vadd.f32 %v167_v12, %v166_v10  ;;  %v174_v15 = vrot.slane %v173_v13, 1 }
  0x1f   : > { %v175_v16 = vadd.f32 %v174_v15, %v173_v13  ;;  %v176_v17 = vmul.f32 0.25, %v168_v14 }
  0x21   : > { %v177_v18 = vmul.f32 0.25, %v175_v16  ;;  %v178_v19 = vadd.f32 1e-08, %v176_v17 }
  0x23   : > { %v179_v20 = vadd.f32 1e-08, %v177_v18  ;;  %312 = vrsqrt.f32 %v178_v19 }
  0x25   : > { %314 = vrsqrt.f32 %v179_v20 }
  0x30   : > { %v313_v21 = vpop.eup %312 }
  0x32   : > { %v315_v22 = vpop.eup %314 }
  0x33   : > { %v184_v23 = vcombine.low %v313_v21, %v315_v22 }
  0x35   : > { %v186_v24 = vmul.f32 %v184_v23, %v156_v0 }
  0x37   : > { %187 = vst [vmem:[%s154_s16] sm:$0xff] %v186_v24 }
  0x38 PF: > { %s11_s8 = sadd.s32 1, %s338_s8   ;;  %s392_s6 = smov %s334_s7 }
  0x39   : > { %p8_p5 = scmp.ge.s32.totalorder %s11_s8, 4   ;;  %s393_s7 = smov %s395_s9 }
  0x3b   :  { %10 = sbr.rel (!%p8_p5) target bundleno = 2 (0x2), region = 54 }

</bundles_post_ra>
